<compile_context>
chip_gen: v7x
topology: tpu7x:2x2x1
jax: 0.10.0
libtpu: 0.0.40
codegen_flags: <defaults>
</compile_context>

<pallas_src>
import functools

import jax
import jax.numpy as jnp
from jax.experimental import pallas as pl
from jax.experimental.pallas import tpu as pltpu


def disc_head_kernel(
    pos_ref, xa_ref,
    hp_ref, invp_ref,
    wpa_ref, bpa_ref,
    wa_ref, ba_ref,
    w1p_ref, w1dir_ref, b1_ref,
    w2_ref, b2_ref, w3_ref, b3_ref,
    out_ref,
    *, bt, n_nodes, dim_a, npows):
  f32 = jnp.float32
  rows = bt * n_nodes
  dh = dim_a * npows

  pos = pos_ref[...]                       # (bt, 3, N, 3)
  p0 = pos[:, 0].reshape(rows, 3)
  p1 = pos[:, 1].reshape(rows, 3)
  p2 = pos[:, 2].reshape(rows, 3)
  d01 = p1 - p0
  d12 = p2 - p1
  d20 = p0 - p2

  # ---- PosEmbed, scalar branch: |0.3*d_c|^2 -> TensLinear(0, 3, dim_a).
  # K=3 is too small for the MXU; expand as three broadcast mults on the VPU
  # (no lane concat, no tiny matmul). 0.3^2 is pre-folded into w_pa.
  wpa = wpa_ref[...]                       # (3, dim_a)
  dx_a = ((d01 * d01).sum(-1, keepdims=True) * wpa[0:1, :]
          + (d12 * d12).sum(-1, keepdims=True) * wpa[1:2, :]
          + (d20 * d20).sum(-1, keepdims=True) * wpa[2:3, :]
          + bpa_ref[...])

  x_a = xa_ref[...].reshape(rows, dim_a) + dx_a                        # (rows, dim_a)

  # ---- lin_in_a -> squared activation
  y_a = jnp.dot(x_a, wa_ref[...], preferred_element_type=f32) + ba_ref[...]
  x_a_a = 1e-6 + y_a * y_a                                             # (rows, dim_a)

  # ---- generalized power means over nodes (lane-dense, shared log, p-major layout;
  #      hp/invp/w1p were permuted on the host to match).
  lx = jnp.log(x_a_a)                                                  # (rows, dim_a)
  lx_rep = jnp.tile(lx, (1, npows))                                    # (rows, dh)
  xp = jnp.exp(lx_rep * hp_ref[...])                                   # x_a_a ** (p/2)
  mean_p = jnp.mean(xp.reshape(bt, n_nodes, dh), axis=1)               # (bt, dh)
  pflat = jnp.exp(jnp.log(mean_p) * invp_ref[...])                     # mean ** (1/p)

  # ---- direct branch: lin_dir was composed into w1dir on the host, so the node sum
  #      feeds the head matmul directly.
  x_a_sum = x_a.reshape(bt, n_nodes, dim_a).sum(axis=1)                # (bt, dim_a)

  # ---- MLP head (w1 pre-folded: 3x-repeated pflat blocks summed, lin_dir composed in)
  h1 = jnp.maximum(
      jnp.dot(pflat, w1p_ref[...], preferred_element_type=f32)
      + jnp.dot(x_a_sum, w1dir_ref[...], preferred_element_type=f32)
      + b1_ref[...], 0.0)
  h2 = jnp.maximum(jnp.dot(h1, w2_ref[...], preferred_element_type=f32) + b2_ref[...], 0.0)
  out_ref[...] = jnp.dot(h2, w3_ref[...], preferred_element_type=f32) + b3_ref[...]


def disc_head_forward(params, pos_0, pos_1, pos_2, x_a, x_v, x_d, box=None,
                      *, batch_tile=None):
  # x_v, x_d and box never influence the output of the reference forward; they are not
  # DMA'd to the kernel at all (removes the largest HBM traffic + wrapper transposes).
  del box, x_v, x_d
  B, N, _ = pos_0.shape
  dim_a = x_a.shape[-1]
  npows = params["pows"].shape[-1]
  heads = params["b3"].shape[-1]
  dh = dim_a * npows

  bt = B if batch_tile is None else batch_tile
  assert B % bt == 0, (B, bt)

  # Pack the three position arrays -> one DMA per grid step.
  pos = jnp.stack([pos_0, pos_1, pos_2], axis=1)                       # (B, 3, N, 3)

  # ---- host-side parameter preprocessing (done once per call, tiny) ----
  pows = params["pows"]                                                # (1, npows)
  # p-major flat layout: index q*dim_a + a
  half_pows_rep = jnp.repeat(0.5 * pows, dim_a, axis=1)                # (1, dh)
  inv_pows_rep = jnp.repeat(1.0 / pows, dim_a, axis=1)                 # (1, dh)
  w_pa_s = 0.09 * params["w_pa"]                                       # fold 0.3^2
  # w1 = [pflat | pflat | pflat | x_dir] blocks: sum the 3 pflat blocks, permute the
  # rows from a-major (reference pflat layout) to p-major (kernel layout), and compose
  # lin_dir into the x_dir block.
  w1 = params["w1"]                                                    # (dim_a*(1+3*npows), dh)
  w1_p = w1[0:dh] + w1[dh:2 * dh] + w1[2 * dh:3 * dh]                  # (dh, dh) a-major rows
  w1_p = w1_p.reshape(dim_a, npows, dh).transpose(1, 0, 2).reshape(dh, dh)
  w1_dir = w1[3 * dh:]                                                 # (dim_a, dh)
  w1_dir_f = params["w_dir"] @ w1_dir                                  # (dim_a, dh)
  b1_f = params["b1"] + params["b_dir"] @ w1_dir                       # (1, dh)

  inputs = [pos, x_a,
            half_pows_rep, inv_pows_rep,
            w_pa_s, params["b_pa"],
            params["w_a"], params["b_a"],
            w1_p, w1_dir_f, b1_f,
            params["w2"], params["b2"],
            params["w3"], params["b3"]]

  def batched_spec(shape):
    nd = len(shape)
    return pl.BlockSpec((bt,) + shape[1:], lambda b, _nd=nd: (b,) + (0,) * (_nd - 1))

  def full_spec(shape):
    nd = len(shape)
    return pl.BlockSpec(shape, lambda b, _nd=nd: (0,) * _nd)

  in_specs = [batched_spec(a.shape) if i < 2 else full_spec(a.shape)
              for i, a in enumerate(inputs)]

  kernel = functools.partial(disc_head_kernel, bt=bt, n_nodes=N, dim_a=dim_a, npows=npows)

  return pl.pallas_call(
      kernel,
      out_shape=jax.ShapeDtypeStruct((B, heads), jnp.float32),
      grid_spec=pltpu.PrefetchScalarGridSpec(
          num_scalar_prefetch=0,
          grid=(B // bt,),
          in_specs=in_specs,
          out_specs=pl.BlockSpec((bt, heads), lambda b: (b, 0)),
      ),
      compiler_params=pltpu.CompilerParams(
          dimension_semantics=("parallel",)),
  )(*inputs)


def init_params(key, dim_a, dim_v, dim_d, heads, npows=12):
  pows = jnp.array([0.5, 0.75, 0.9, 1.0, 1.1, 1.5, 1.9, 2.0, 2.1, 2.5, 3.0, 4.0],
                   dtype=jnp.float32).reshape(1, npows)
  ks = jax.random.split(key, 16)

  def w(k, shape, scale=0.2):
    return scale * jax.random.normal(k, shape, dtype=jnp.float32)

  din = dim_a * (1 + 3 * npows)
  dh = dim_a * npows
  return dict(
      pows=pows,
      w_pa=w(ks[0], (3, dim_a)), b_pa=w(ks[1], (1, dim_a), 0.05),
      w_pv=w(ks[2], (3, dim_v)),
      w_a=w(ks[3], (dim_a, dim_a)), b_a=w(ks[4], (1, dim_a), 0.05),
      w_v=w(ks[5], (dim_v, dim_a)),
      w_d=w(ks[6], (dim_d, dim_a)),
      w_dir=w(ks[7], (dim_a, dim_a)), b_dir=w(ks[8], (1, dim_a), 0.05),
      w1=w(ks[9], (din, dh)), b1=w(ks[10], (1, dh), 0.05),
      w2=w(ks[11], (dh, dh)), b2=w(ks[12], (1, dh), 0.05),
      w3=w(ks[13], (dh, heads)), b3=w(ks[14], (1, heads), 0.05),
  )


def reference_forward(params, pos_0, pos_1, pos_2, x_a, x_v, x_d):
  """Pure-JAX mirror of the PyTorch forward, for validation."""
  pows = params["pows"][0]
  d01 = 0.3 * (pos_1 - pos_0)
  d12 = 0.3 * (pos_2 - pos_1)
  d20 = 0.3 * (pos_0 - pos_2)
  dpos = jnp.stack([d01, d12, d20], axis=2)                     # (B, N, 3c, 3comp)
  sq = (dpos ** 2).sum(-1)
  dx_a = sq @ params["w_pa"] + params["b_pa"][0]
  dx_v = jnp.einsum("bncx,cv->bnvx", dpos, params["w_pv"])
  xa = x_a + dx_a
  xv = x_v + dx_v
  y_a = xa @ params["w_a"] + params["b_a"][0]
  x_a_a = 1e-6 + y_a ** 2
  y_v = jnp.einsum("bnvx,va->bnax", xv, params["w_v"])
  _x_v_a = 1e-6 + (y_v ** 2).sum(-1)                            # unused, as in reference
  y_d = jnp.einsum("bndij,da->bnaij", x_d, params["w_d"])
  _x_d_a = 1e-6 + (y_d ** 2).sum((-1, -2))                      # unused, as in reference
  B, _, dim_a = x_a_a.shape
  npows = pows.shape[0]
  p = (x_a_a[..., None] ** (0.5 * pows)).mean(1) ** (1.0 / pows)
  pf = p.reshape(B, dim_a * npows)
  xdir = xa.sum(1) @ params["w_dir"] + params["b_dir"][0]
  xin = jnp.concatenate([pf, pf, pf, xdir], axis=-1)
  h1 = jax.nn.relu(xin @ params["w1"] + params["b1"][0])
  h2 = jax.nn.relu(h1 @ params["w2"] + params["b2"][0])
  return h2 @ params["w3"] + params["b3"][0]


if __name__ == "__main__":
  B, N = 2, 16
  dim_a, dim_v, dim_d, heads = 8, 6, 5, 4

  key = jax.random.PRNGKey(0)
  ks = jax.random.split(key, 8)
  pos_0 = jax.random.normal(ks[0], (B, N, 3), jnp.float32)
  pos_1 = jax.random.normal(ks[1], (B, N, 3), jnp.float32)
  pos_2 = jax.random.normal(ks[2], (B, N, 3), jnp.float32)
  x_a = jax.random.normal(ks[3], (B, N, dim_a), jnp.float32)
  x_v = jax.random.normal(ks[4], (B, N, dim_v, 3), jnp.float32)
  x_d = jax.random.normal(ks[5], (B, N, dim_d, 3, 3), jnp.float32)
  box = None
  params = init_params(ks[6], dim_a, dim_v, dim_d, heads)

  out = disc_head_forward(params, pos_0, pos_1, pos_2, x_a, x_v, x_d, box)
  out = jax.block_until_ready(out)

  ref = reference_forward(params, pos_0, pos_1, pos_2, x_a, x_v, x_d)
  assert out.shape == (B, heads), out.shape
  assert jnp.allclose(out, ref, rtol=2e-2, atol=2e-3), (out, ref)
  print("KERNEL_OK")
</pallas_src>

<mosaic_0001>
module attributes {stable_mosaic.version = 11 : i64} {
  func.func @disc_head_kernel(%arg0: i32, %arg1: memref<2x3x16x3xf32, #tpu.memory_space<vmem>>, %arg2: memref<2x16x8xf32, #tpu.memory_space<vmem>>, %arg3: memref<1x96xf32, #tpu.memory_space<vmem>>, %arg4: memref<1x96xf32, #tpu.memory_space<vmem>>, %arg5: memref<3x8xf32, #tpu.memory_space<vmem>>, %arg6: memref<1x8xf32, #tpu.memory_space<vmem>>, %arg7: memref<8x8xf32, #tpu.memory_space<vmem>>, %arg8: memref<1x8xf32, #tpu.memory_space<vmem>>, %arg9: memref<96x96xf32, #tpu.memory_space<vmem>>, %arg10: memref<8x96xf32, #tpu.memory_space<vmem>>, %arg11: memref<1x96xf32, #tpu.memory_space<vmem>>, %arg12: memref<96x96xf32, #tpu.memory_space<vmem>>, %arg13: memref<1x96xf32, #tpu.memory_space<vmem>>, %arg14: memref<96x4xf32, #tpu.memory_space<vmem>>, %arg15: memref<1x4xf32, #tpu.memory_space<vmem>>, %arg16: memref<2x4xf32, #tpu.memory_space<vmem>>) attributes {dimension_semantics = [#tpu.dimension_semantics<parallel>], iteration_bounds = array<i64: 1>, scalar_prefetch = 0 : i64, scratch_operands = 0 : i64, tpu.core_type = #tpu.core_type<tc>, window_params = [{transform_indices = @transform_0, window_bounds = array<i64: 2, 3, 16, 3>}, {transform_indices = @transform_1, window_bounds = array<i64: 2, 16, 8>}, {pipeline_mode = #tpu.pipeline_mode<synchronous>, transform_indices = @transform_2, window_bounds = array<i64: 1, 96>}, {pipeline_mode = #tpu.pipeline_mode<synchronous>, transform_indices = @transform_3, window_bounds = array<i64: 1, 96>}, {pipeline_mode = #tpu.pipeline_mode<synchronous>, transform_indices = @transform_4, window_bounds = array<i64: 3, 8>}, {pipeline_mode = #tpu.pipeline_mode<synchronous>, transform_indices = @transform_5, window_bounds = array<i64: 1, 8>}, {pipeline_mode = #tpu.pipeline_mode<synchronous>, transform_indices = @transform_6, window_bounds = array<i64: 8, 8>}, {pipeline_mode = #tpu.pipeline_mode<synchronous>, transform_indices = @transform_7, window_bounds = array<i64: 1, 8>}, {pipeline_mode = #tpu.pipeline_mode<synchronous>, transform_indices = @transform_8, window_bounds = array<i64: 96, 96>}, {pipeline_mode = #tpu.pipeline_mode<synchronous>, transform_indices = @transform_9, window_bounds = array<i64: 8, 96>}, {pipeline_mode = #tpu.pipeline_mode<synchronous>, transform_indices = @transform_10, window_bounds = array<i64: 1, 96>}, {pipeline_mode = #tpu.pipeline_mode<synchronous>, transform_indices = @transform_11, window_bounds = array<i64: 96, 96>}, {pipeline_mode = #tpu.pipeline_mode<synchronous>, transform_indices = @transform_12, window_bounds = array<i64: 1, 96>}, {pipeline_mode = #tpu.pipeline_mode<synchronous>, transform_indices = @transform_13, window_bounds = array<i64: 96, 4>}, {pipeline_mode = #tpu.pipeline_mode<synchronous>, transform_indices = @transform_14, window_bounds = array<i64: 1, 4>}, {transform_indices = @transform_15, window_bounds = array<i64: 2, 4>}]} {
    %c0 = arith.constant 0 : index
    %c0_0 = arith.constant 0 : index
    %c0_1 = arith.constant 0 : index
    %c0_2 = arith.constant 0 : index
    %0 = vector.load %arg1[%c0, %c0_0, %c0_1, %c0_2] : memref<2x3x16x3xf32, #tpu.memory_space<vmem>>, vector<2x3x16x3xf32>
    %1 = vector.extract_strided_slice %0 {offsets = [0, 0, 0, 0], sizes = [2, 1, 16, 3], strides = [1, 1, 1, 1]} : vector<2x3x16x3xf32> to vector<2x1x16x3xf32>
    %2 = vector.shape_cast %1 : vector<2x1x16x3xf32> to vector<2x16x3xf32>
    %3 = vector.shape_cast %2 : vector<2x16x3xf32> to vector<32x3xf32>
    %4 = vector.extract_strided_slice %0 {offsets = [0, 1, 0, 0], sizes = [2, 1, 16, 3], strides = [1, 1, 1, 1]} : vector<2x3x16x3xf32> to vector<2x1x16x3xf32>
    %5 = vector.shape_cast %4 : vector<2x1x16x3xf32> to vector<2x16x3xf32>
    %6 = vector.shape_cast %5 : vector<2x16x3xf32> to vector<32x3xf32>
    %7 = vector.extract_strided_slice %0 {offsets = [0, 2, 0, 0], sizes = [2, 1, 16, 3], strides = [1, 1, 1, 1]} : vector<2x3x16x3xf32> to vector<2x1x16x3xf32>
    %8 = vector.shape_cast %7 : vector<2x1x16x3xf32> to vector<2x16x3xf32>
    %9 = vector.shape_cast %8 : vector<2x16x3xf32> to vector<32x3xf32>
    %10 = arith.subf %6, %3 : vector<32x3xf32>
    %11 = arith.subf %9, %6 : vector<32x3xf32>
    %12 = arith.subf %3, %9 : vector<32x3xf32>
    %c0_3 = arith.constant 0 : index
    %c0_4 = arith.constant 0 : index
    %13 = vector.load %arg5[%c0_3, %c0_4] : memref<3x8xf32, #tpu.memory_space<vmem>>, vector<3x8xf32>
    %14 = arith.mulf %10, %10 : vector<32x3xf32>
    %cst = arith.constant dense<0.000000e+00> : vector<32xf32>
    %15 = vector.multi_reduction <add>, %14, %cst [1] : vector<32x3xf32> to vector<32xf32>
    %16 = vector.shape_cast %15 : vector<32xf32> to vector<32x1xf32>
    %17 = vector.extract_strided_slice %13 {offsets = [0, 0], sizes = [1, 8], strides = [1, 1]} : vector<3x8xf32> to vector<1x8xf32>
    %18 = vector.broadcast %16 : vector<32x1xf32> to vector<32x8xf32>
    %19 = vector.broadcast %17 : vector<1x8xf32> to vector<32x8xf32>
    %20 = arith.mulf %18, %19 : vector<32x8xf32>
    %21 = arith.mulf %11, %11 : vector<32x3xf32>
    %cst_5 = arith.constant dense<0.000000e+00> : vector<32xf32>
    %22 = vector.multi_reduction <add>, %21, %cst_5 [1] : vector<32x3xf32> to vector<32xf32>
    %23 = vector.shape_cast %22 : vector<32xf32> to vector<32x1xf32>
    %24 = vector.extract_strided_slice %13 {offsets = [1, 0], sizes = [1, 8], strides = [1, 1]} : vector<3x8xf32> to vector<1x8xf32>
    %25 = vector.broadcast %23 : vector<32x1xf32> to vector<32x8xf32>
    %26 = vector.broadcast %24 : vector<1x8xf32> to vector<32x8xf32>
    %27 = arith.mulf %25, %26 : vector<32x8xf32>
    %28 = arith.addf %20, %27 : vector<32x8xf32>
    %29 = arith.mulf %12, %12 : vector<32x3xf32>
    %cst_6 = arith.constant dense<0.000000e+00> : vector<32xf32>
    %30 = vector.multi_reduction <add>, %29, %cst_6 [1] : vector<32x3xf32> to vector<32xf32>
    %31 = vector.shape_cast %30 : vector<32xf32> to vector<32x1xf32>
    %32 = vector.extract_strided_slice %13 {offsets = [2, 0], sizes = [1, 8], strides = [1, 1]} : vector<3x8xf32> to vector<1x8xf32>
    %33 = vector.broadcast %31 : vector<32x1xf32> to vector<32x8xf32>
    %34 = vector.broadcast %32 : vector<1x8xf32> to vector<32x8xf32>
    %35 = arith.mulf %33, %34 : vector<32x8xf32>
    %36 = arith.addf %28, %35 : vector<32x8xf32>
    %c0_7 = arith.constant 0 : index
    %c0_8 = arith.constant 0 : index
    %37 = vector.load %arg6[%c0_7, %c0_8] : memref<1x8xf32, #tpu.memory_space<vmem>>, vector<1x8xf32>
    %38 = vector.broadcast %37 : vector<1x8xf32> to vector<32x8xf32>
    %39 = arith.addf %36, %38 : vector<32x8xf32>
    %c0_9 = arith.constant 0 : index
    %c0_10 = arith.constant 0 : index
    %c0_11 = arith.constant 0 : index
    %40 = vector.load %arg2[%c0_9, %c0_10, %c0_11] : memref<2x16x8xf32, #tpu.memory_space<vmem>>, vector<2x16x8xf32>
    %41 = vector.shape_cast %40 : vector<2x16x8xf32> to vector<32x8xf32>
    %42 = arith.addf %41, %39 : vector<32x8xf32>
    %c0_12 = arith.constant 0 : index
    %c0_13 = arith.constant 0 : index
    %43 = vector.load %arg7[%c0_12, %c0_13] : memref<8x8xf32, #tpu.memory_space<vmem>>, vector<8x8xf32>
    %cst_14 = arith.constant dense<0.000000e+00> : vector<32x8xf32>
    %44 = tpu.matmul %42, %43, %cst_14 {dimension_numbers = #tpu.dot_dimension_numbers<[1], [0], [0], [1], [0, 0, 1, 1], [], []>} : vector<32x8xf32>, vector<8x8xf32>, vector<32x8xf32> -> vector<32x8xf32>
    %c0_15 = arith.constant 0 : index
    %c0_16 = arith.constant 0 : index
    %45 = vector.load %arg8[%c0_15, %c0_16] : memref<1x8xf32, #tpu.memory_space<vmem>>, vector<1x8xf32>
    %46 = vector.broadcast %45 : vector<1x8xf32> to vector<32x8xf32>
    %47 = arith.addf %44, %46 : vector<32x8xf32>
    %48 = arith.mulf %47, %47 : vector<32x8xf32>
    %cst_17 = arith.constant 9.99999997E-7 : f32
    %49 = vector.broadcast %cst_17 : f32 to vector<32x8xf32>
    %50 = arith.addf %49, %48 : vector<32x8xf32>
    %51 = math.log %50 : vector<32x8xf32>
    %52 = tpu.concatenate %51, %51, %51, %51, %51, %51, %51, %51, %51, %51, %51, %51 in 1 : vector<32x8xf32>, vector<32x8xf32>, vector<32x8xf32>, vector<32x8xf32>, vector<32x8xf32>, vector<32x8xf32>, vector<32x8xf32>, vector<32x8xf32>, vector<32x8xf32>, vector<32x8xf32>, vector<32x8xf32>, vector<32x8xf32> -> vector<32x96xf32>
    %c0_18 = arith.constant 0 : index
    %c0_19 = arith.constant 0 : index
    %53 = vector.load %arg3[%c0_18, %c0_19] : memref<1x96xf32, #tpu.memory_space<vmem>>, vector<1x96xf32>
    %54 = vector.broadcast %53 : vector<1x96xf32> to vector<32x96xf32>
    %55 = arith.mulf %52, %54 : vector<32x96xf32>
    %56 = math.exp %55 : vector<32x96xf32>
    %57 = vector.shape_cast %56 : vector<32x96xf32> to vector<2x16x96xf32>
    %cst_20 = arith.constant dense<0.000000e+00> : vector<2x96xf32>
    %58 = vector.multi_reduction <add>, %57, %cst_20 [1] : vector<2x16x96xf32> to vector<2x96xf32>
    %cst_21 = arith.constant 1.600000e+01 : f32
    %59 = vector.broadcast %cst_21 : f32 to vector<2x96xf32>
    %60 = arith.divf %58, %59 : vector<2x96xf32>
    %61 = math.log %60 : vector<2x96xf32>
    %c0_22 = arith.constant 0 : index
    %c0_23 = arith.constant 0 : index
    %62 = vector.load %arg4[%c0_22, %c0_23] : memref<1x96xf32, #tpu.memory_space<vmem>>, vector<1x96xf32>
    %63 = vector.broadcast %62 : vector<1x96xf32> to vector<2x96xf32>
    %64 = arith.mulf %61, %63 : vector<2x96xf32>
    %65 = math.exp %64 : vector<2x96xf32>
    %66 = vector.shape_cast %42 : vector<32x8xf32> to vector<2x16x8xf32>
    %cst_24 = arith.constant dense<0.000000e+00> : vector<2x8xf32>
    %67 = vector.multi_reduction <add>, %66, %cst_24 [1] : vector<2x16x8xf32> to vector<2x8xf32>
    %c0_25 = arith.constant 0 : index
    %c0_26 = arith.constant 0 : index
    %68 = vector.load %arg9[%c0_25, %c0_26] : memref<96x96xf32, #tpu.memory_space<vmem>>, vector<96x96xf32>
    %cst_27 = arith.constant dense<0.000000e+00> : vector<2x96xf32>
    %69 = tpu.matmul %65, %68, %cst_27 {dimension_numbers = #tpu.dot_dimension_numbers<[1], [0], [0], [1], [0, 0, 1, 1], [], []>} : vector<2x96xf32>, vector<96x96xf32>, vector<2x96xf32> -> vector<2x96xf32>
    %c0_28 = arith.constant 0 : index
    %c0_29 = arith.constant 0 : index
    %70 = vector.load %arg10[%c0_28, %c0_29] : memref<8x96xf32, #tpu.memory_space<vmem>>, vector<8x96xf32>
    %cst_30 = arith.constant dense<0.000000e+00> : vector<2x96xf32>
    %71 = tpu.matmul %67, %70, %cst_30 {dimension_numbers = #tpu.dot_dimension_numbers<[1], [0], [0], [1], [0, 0, 1, 1], [], []>} : vector<2x8xf32>, vector<8x96xf32>, vector<2x96xf32> -> vector<2x96xf32>
    %72 = arith.addf %69, %71 : vector<2x96xf32>
    %c0_31 = arith.constant 0 : index
    %c0_32 = arith.constant 0 : index
    %73 = vector.load %arg11[%c0_31, %c0_32] : memref<1x96xf32, #tpu.memory_space<vmem>>, vector<1x96xf32>
    %74 = vector.broadcast %73 : vector<1x96xf32> to vector<2x96xf32>
    %75 = arith.addf %72, %74 : vector<2x96xf32>
    %cst_33 = arith.constant 0.000000e+00 : f32
    %76 = vector.broadcast %cst_33 : f32 to vector<2x96xf32>
    %77 = arith.maximumf %75, %76 : vector<2x96xf32>
    %c0_34 = arith.constant 0 : index
    %c0_35 = arith.constant 0 : index
    %78 = vector.load %arg12[%c0_34, %c0_35] : memref<96x96xf32, #tpu.memory_space<vmem>>, vector<96x96xf32>
    %cst_36 = arith.constant dense<0.000000e+00> : vector<2x96xf32>
    %79 = tpu.matmul %77, %78, %cst_36 {dimension_numbers = #tpu.dot_dimension_numbers<[1], [0], [0], [1], [0, 0, 1, 1], [], []>} : vector<2x96xf32>, vector<96x96xf32>, vector<2x96xf32> -> vector<2x96xf32>
    %c0_37 = arith.constant 0 : index
    %c0_38 = arith.constant 0 : index
    %80 = vector.load %arg13[%c0_37, %c0_38] : memref<1x96xf32, #tpu.memory_space<vmem>>, vector<1x96xf32>
    %81 = vector.broadcast %80 : vector<1x96xf32> to vector<2x96xf32>
    %82 = arith.addf %79, %81 : vector<2x96xf32>
    %cst_39 = arith.constant 0.000000e+00 : f32
    %83 = vector.broadcast %cst_39 : f32 to vector<2x96xf32>
    %84 = arith.maximumf %82, %83 : vector<2x96xf32>
    %c0_40 = arith.constant 0 : index
    %c0_41 = arith.constant 0 : index
    %85 = vector.load %arg14[%c0_40, %c0_41] : memref<96x4xf32, #tpu.memory_space<vmem>>, vector<96x4xf32>
    %cst_42 = arith.constant dense<0.000000e+00> : vector<2x4xf32>
    %86 = tpu.matmul %84, %85, %cst_42 {dimension_numbers = #tpu.dot_dimension_numbers<[1], [0], [0], [1], [0, 0, 1, 1], [], []>} : vector<2x96xf32>, vector<96x4xf32>, vector<2x4xf32> -> vector<2x4xf32>
    %c0_43 = arith.constant 0 : index
    %c0_44 = arith.constant 0 : index
    %87 = vector.load %arg15[%c0_43, %c0_44] : memref<1x4xf32, #tpu.memory_space<vmem>>, vector<1x4xf32>
    %88 = vector.broadcast %87 : vector<1x4xf32> to vector<2x4xf32>
    %89 = arith.addf %86, %88 : vector<2x4xf32>
    %c0_45 = arith.constant 0 : index
    %c0_46 = arith.constant 0 : index
    %90 = vector.load %arg16[%c0_45, %c0_46] : memref<2x4xf32, #tpu.memory_space<vmem>>, vector<2x4xf32>
    tpu.vector_store %arg16[%c0_45, %c0_46], %89 {strides = array<i32>} : memref<2x4xf32, #tpu.memory_space<vmem>>, vector<2x4xf32>,
    return
  }
  func.func @transform_0(%arg0: i32) -> (i32, i32, i32, i32) {
    %c0_i32 = arith.constant 0 : i32
    %c0_i32_0 = arith.constant 0 : i32
    %c0_i32_1 = arith.constant 0 : i32
    %c0_i32_2 = arith.constant 0 : i32
    return %arg0, %c0_i32, %c0_i32_0, %c0_i32_1 : i32, i32, i32, i32
  }
  func.func @transform_1(%arg0: i32) -> (i32, i32, i32) {
    %c0_i32 = arith.constant 0 : i32
    %c0_i32_0 = arith.constant 0 : i32
    %c0_i32_1 = arith.constant 0 : i32
    return %arg0, %c0_i32, %c0_i32_0 : i32, i32, i32
  }
  func.func @transform_2(%arg0: i32) -> (i32, i32) {
    %c0_i32 = arith.constant 0 : i32
    %c0_i32_0 = arith.constant 0 : i32
    %c0_i32_1 = arith.constant 0 : i32
    return %c0_i32, %c0_i32_0 : i32, i32
  }
  func.func @transform_3(%arg0: i32) -> (i32, i32) {
    %c0_i32 = arith.constant 0 : i32
    %c0_i32_0 = arith.constant 0 : i32
    %c0_i32_1 = arith.constant 0 : i32
    return %c0_i32, %c0_i32_0 : i32, i32
  }
  func.func @transform_4(%arg0: i32) -> (i32, i32) {
    %c0_i32 = arith.constant 0 : i32
    %c0_i32_0 = arith.constant 0 : i32
    %c0_i32_1 = arith.constant 0 : i32
    return %c0_i32, %c0_i32_0 : i32, i32
  }
  func.func @transform_5(%arg0: i32) -> (i32, i32) {
    %c0_i32 = arith.constant 0 : i32
    %c0_i32_0 = arith.constant 0 : i32
    %c0_i32_1 = arith.constant 0 : i32
    return %c0_i32, %c0_i32_0 : i32, i32
  }
  func.func @transform_6(%arg0: i32) -> (i32, i32) {
    %c0_i32 = arith.constant 0 : i32
    %c0_i32_0 = arith.constant 0 : i32
    %c0_i32_1 = arith.constant 0 : i32
    return %c0_i32, %c0_i32_0 : i32, i32
  }
  func.func @transform_7(%arg0: i32) -> (i32, i32) {
    %c0_i32 = arith.constant 0 : i32
    %c0_i32_0 = arith.constant 0 : i32
    %c0_i32_1 = arith.constant 0 : i32
    return %c0_i32, %c0_i32_0 : i32, i32
  }
  func.func @transform_8(%arg0: i32) -> (i32, i32) {
    %c0_i32 = arith.constant 0 : i32
    %c0_i32_0 = arith.constant 0 : i32
    %c0_i32_1 = arith.constant 0 : i32
    return %c0_i32, %c0_i32_0 : i32, i32
  }
  func.func @transform_9(%arg0: i32) -> (i32, i32) {
    %c0_i32 = arith.constant 0 : i32
    %c0_i32_0 = arith.constant 0 : i32
    %c0_i32_1 = arith.constant 0 : i32
    return %c0_i32, %c0_i32_0 : i32, i32
  }
  func.func @transform_10(%arg0: i32) -> (i32, i32) {
    %c0_i32 = arith.constant 0 : i32
    %c0_i32_0 = arith.constant 0 : i32
    %c0_i32_1 = arith.constant 0 : i32
    return %c0_i32, %c0_i32_0 : i32, i32
  }
  func.func @transform_11(%arg0: i32) -> (i32, i32) {
    %c0_i32 = arith.constant 0 : i32
    %c0_i32_0 = arith.constant 0 : i32
    %c0_i32_1 = arith.constant 0 : i32
    return %c0_i32, %c0_i32_0 : i32, i32
  }
  func.func @transform_12(%arg0: i32) -> (i32, i32) {
    %c0_i32 = arith.constant 0 : i32
    %c0_i32_0 = arith.constant 0 : i32
    %c0_i32_1 = arith.constant 0 : i32
    return %c0_i32, %c0_i32_0 : i32, i32
  }
  func.func @transform_13(%arg0: i32) -> (i32, i32) {
    %c0_i32 = arith.constant 0 : i32
    %c0_i32_0 = arith.constant 0 : i32
    %c0_i32_1 = arith.constant 0 : i32
    return %c0_i32, %c0_i32_0 : i32, i32
  }
  func.func @transform_14(%arg0: i32) -> (i32, i32) {
    %c0_i32 = arith.constant 0 : i32
    %c0_i32_0 = arith.constant 0 : i32
    %c0_i32_1 = arith.constant 0 : i32
    return %c0_i32, %c0_i32_0 : i32, i32
  }
  func.func @transform_15(%arg0: i32) -> (i32, i32) {
    %c0_i32 = arith.constant 0 : i32
    %c0_i32_0 = arith.constant 0 : i32
    return %arg0, %c0_i32 : i32, i32
  }
}

</mosaic_0001>

<bundles_post_ra>
// kernel: tpu_custom_call.1
= control target key start
LH: loop header
LB: loop body
LE: loop exit
PB: predicated region body
PF: predicated region fallthrough
CT: control target
= control target key end

     0   :  { %vm80_vm0 = vcmask 23552   ;;  %s1706_s0 = inlined_call_operand.vmem [shape: f32[2,3,16,3], index: 0, kind: input, shape index: {}]   ;;  %s1707_s1 = inlined_call_operand.vmem [shape: f32[2,16,8], index: 1, kind: input, shape index: {}]   ;;  %s1708_s2 = inlined_call_operand.vmem [shape: f32[1,96], index: 2, kind: input, shape index: {}]   ;;  %s1709_s3 = inlined_call_operand.vmem [shape: f32[1,96], index: 3, kind: input, shape index: {}]   ;;  %s1710_s4 = inlined_call_operand.vmem [shape: f32[3,8], index: 4, kind: input, shape index: {}]   ;;  %s1711_s5 = inlined_call_operand.vmem [shape: f32[1,8], index: 5, kind: input, shape index: {}]   ;;  %s1712_s6 = inlined_call_operand.vmem [shape: f32[8,8], index: 6, kind: input, shape index: {}]   ;;  %s1713_s7 = inlined_call_operand.vmem [shape: f32[1,8], index: 7, kind: input, shape index: {}]   ;;  %s1714_s8 = inlined_call_operand.vmem [shape: f32[96,96], index: 8, kind: input, shape index: {}]   ;;  %s1715_s9 = inlined_call_operand.vmem [shape: f32[8,96], index: 9, kind: input, shape index: {}]   ;;  %s1716_s10 = inlined_call_operand.vmem [shape: f32[1,96], index: 10, kind: input, shape index: {}]   ;;  %s1717_s11 = inlined_call_operand.vmem [shape: f32[96,96], index: 11, kind: input, shape index: {}]   ;;  %s1718_s12 = inlined_call_operand.vmem [shape: f32[1,96], index: 12, kind: input, shape index: {}]   ;;  %s1719_s13 = inlined_call_operand.vmem [shape: f32[96,4], index: 13, kind: input, shape index: {}]   ;;  %s1720_s14 = inlined_call_operand.vmem [shape: f32[1,4], index: 14, kind: input, shape index: {}]   ;;  %s1721_s15 = inlined_call_operand.hbm [shape: f32[2,4], index: 15, kind: output, shape index: {}]  }
   0x1   :  { %v52_v0 = vld [vmem:[%s1706_s0 + $0x8] sm:$0xff]  ;;  %v54_v1 = vld [vmem:[%s1706_s0 + $0x18] sm:$0xff]  ;;  %v51_v2 = vld [vmem:[%s1706_s0] sm:$0xff] }
   0x2   :  { %v64_v3 = vsub.f32 %v54_v1, %v52_v0  ;;  %v53_v4 = vld [vmem:[%s1706_s0 + $0x10] sm:$0xff]  ;;  %v56_v5 = vld [vmem:[%s1706_s0 + $0x28] sm:$0xff]  ;;  %v55_v6 = vld [vmem:[%s1706_s0 + $0x20] sm:$0xff] }
   0x3   :  { %v63_v7 = vsub.f32 %v53_v4, %v51_v2  ;;  %v68_v8 = vsub.f32 %v56_v5, %v54_v1  ;;  %v67_v9 = vsub.f32 %v55_v6, %v53_v4  ;;  %v72_v11 = vsub.f32 %v52_v0, %v56_v5  ;;  %v59_v16 = vld [vmem:[%s1706_s0 + $0x40] sm:$0xff]  ;;  %v61_v17 = vld [vmem:[%s1706_s0 + $0x50] sm:$0xff] }
   0x4   :  { %v77_v10 = vmul.f32 %v64_v3, %v64_v3  ;;  %v71_v15 = vsub.f32 %v51_v2, %v55_v6 }
   0x5   :  { %v76_v12 = vmul.f32 %v63_v7, %v63_v7  ;;  %v102_v13 = vmul.f32 %v68_v8, %v68_v8  ;;  %v101_v14 = vmul.f32 %v67_v9, %v67_v9 }
   0x6   :  { %20 = vsyncpa [#allocation3], 0  ;;  %v84_v18 = vsel %vm80_vm0, %v77_v10, 0.0  ;;  %v57_v19 = vld [vmem:[%s1706_s0 + $0x30] sm:$0xff]  ;;  %v130_v22 = vmul.f32 %v72_v11, %v72_v11  ;;  %v69_v23 = vsub.f32 %v61_v17, %v59_v16  ;;  %v129_v25 = vmul.f32 %v71_v15, %v71_v15  ;;  %v60_v27 = vld [vmem:[%s1706_s0 + $0x48] sm:$0xff]  ;;  %s1213_s24 = smov 8  }
   0x7   :  { %85 = vadd.xlane.f32.xlu1 %v84_v18  ;;  %v81_v20 = vsel %vm80_vm0, %v76_v12, 0.0  ;;  %v108_v21 = vsel %vm80_vm0, %v102_v13, 0.0  ;;  %v105_v24 = vsel %vm80_vm0, %v101_v14, 0.0  ;;  %v65_v26 = vsub.f32 %v59_v16, %v57_v19  ;;  %v62_v28 = vld [vmem:[%s1706_s0 + $0x58] sm:$0xff]  ;;  %v176_v48 = vld [vmem:[%s1712_s6] sm:$0xff]  ;;  %v169_v11 = vld [vmem:[%s1707_s1 + $0x8] sm:$0xff] }
   0x8   :  { %82 = vadd.xlane.f32.xlu0 %v81_v20  ;;  %v58_v29 = vld [vmem:[%s1706_s0 + $0x38] sm:$0xff]  ;;  %v136_v30 = vsel %vm80_vm0, %v130_v22, 0.0  ;;  %v103_v31 = vmul.f32 %v69_v23, %v69_v23  ;;  %v70_v32 = vsub.f32 %v62_v28, %v60_v27  ;;  %v133_v33 = vsel %vm80_vm0, %v129_v25, 0.0  ;;  %1000 = vmatprep.subr.mxu1 %v176_v48  ;;  %v75_v54 = vld [vmem:[%s1710_s4] sm:$0x7]  ;;  %s1215_s25 = smov 24  }
   0x9   :  { %v78_v34 = vmul.f32 %v65_v26, %v65_v26  ;;  %v66_v35 = vsub.f32 %v60_v27, %v58_v29  ;;  %v74_v38 = vsub.f32 %v58_v29, %v62_v28  ;;  %v73_v41 = vsub.f32 %v57_v19, %v61_v17  ;;  %1001 = vmatpush3.msra.mxu1 %v176_v48  ;;  %v939_v8 = vld [vmem:[%s1711_s5] ss:$0 sm:$0xff]  ;;  %s1216_s26 = smov 32   ;;  %s1217_s0 = smov 40  }
   0xa   :  { %v111_v36 = vsel %vm80_vm0, %v103_v31, 0.0  ;;  %v104_v37 = vmul.f32 %v70_v32, %v70_v32  ;;  %v1211_v49 = vmov 0.0   ;;  %vm1212_vm1 = vmmov 0   ;;  %v168_v16 = vld [vmem:[%s1707_s1] sm:$0xff]  ;;  %s1218_s27 = smov 48   ;;  %s1219_s28 = smov 56  }
   0xb   :  { %109 = vadd.xlane.f32.xlu1 %v108_v21  ;;  %v87_v39 = vsel %vm80_vm0, %v78_v34, 0.0  ;;  %v79_v40 = vmul.f32 %v66_v35, %v66_v35  ;;  %v132_v43 = vmul.f32 %v74_v38, %v74_v38  ;;  %v131_v45 = vmul.f32 %v73_v41, %v73_v41  ;;  %1008 = vmatprep.subr.mxu1 %v1211_v49  ;;  %v576_v26 = vld [vmem:[%s1715_s9] sm:$0xff]  ;;  %v171_v38 = vld [vmem:[%s1707_s1 + $0x18] sm:$0xff]  ;;  %v170_v41 = vld [vmem:[%s1707_s1 + $0x10] sm:$0xff]  ;;  %s1220_s29 = smov 64   ;;  %s1221_s6 = smov 72  }
   0xc   :  { %106 = vadd.xlane.f32.xlu0 %v105_v24  ;;  %v114_v42 = vsel %vm80_vm0, %v104_v37, 0.0  ;;  %1037 = vmatprep.mubr.msk.f32.mxu0 %vm1212_vm1, %v1211_v49  ;;  %v93_v50 = vlaneseq  ;;  %vm184_vm2 = vcmask 64512   ;;  %vm579_vm3 = vcmask 1041409   ;;  %s1222_s30 = smov 80   ;;  %s1223_s4 = smov 88  }
   0xd   :  { %v90_v44 = vsel %vm80_vm0, %v79_v40, 0.0  ;;  %v142_v46 = vsel %vm80_vm0, %v132_v43, 0.0  ;;  %v139_v47 = vsel %vm80_vm0, %v131_v45, 0.0  ;;  %vm438_vm4 = vcmask 130048   ;;  %s1225_s9 = smov [#allocation2]  }
   0xe   :  { %v94_v51 = vshrl.u32 %v93_v50, 7  ;;  %vm443_vm5 = vcmask 195584   ;;  %vm448_vm6 = vcmask 261120   ;;  %vm453_vm7 = vcmask 326656   ;;  %s931_s22 = sshll.u32 %s1225_s9, 4  ;;  %s932_s22 = int_to_ptr.vmem [resolvable:$true] %s931_s22 }
   0xf   :  { %137 = vadd.xlane.f32.xlu1 %v136_v30  ;;  %vm458_vm8 = vcmask 392192   ;;  %vm463_vm9 = vcmask 457728   ;;  %vm468_vm10 = vcmask 523264   ;;  %vm473_vm11 = vcmask 588800   ;;  %p1192_p1 = scmp.lt.s32.totalorder %s932_s22, %s932_s22 }
  0x10   :  { %134 = vadd.xlane.f32.xlu0 %v133_v33  ;;  %v119_v52 = vsub.s32 1, %v94_v51  ;;  %v95_v53 = vsub.s32 0, %v94_v51  ;;  %v147_v58 = vsub.s32 2, %v94_v51  ;;  %vm478_vm12 = vcmask 654336  }
  0x11   :  { %vm483_vm13 = vcmask 719872   ;;  %vm507_vm14 = vcmask 785408   ;;  %vm923_vm15 = vcmask 25600  }
  0x12   :  { %v120_v57 = vrot.slane %v75_v54, %v119_v52  ;;  %v96_v59 = vrot.slane %v75_v54, %v95_v53  ;;  %v148_v63 = vrot.slane %v75_v54, %v147_v58 }
  0x13   :  { %112 = vadd.xlane.f32.xlu1 %v111_v36 }
  0x14   :  { %88 = vadd.xlane.f32.xlu0 %v87_v39 }
  0x17   :  { %115 = vadd.xlane.f32.xlu1 %v114_v42 }
  0x18   :  { %91 = vadd.xlane.f32.xlu0 %v90_v44 }
  0x1b   :  { %143 = vadd.xlane.f32.xlu1 %v142_v46 }
  0x1c   :  { %140 = vadd.xlane.f32.xlu0 %v139_v47 }
  0x94   :  { %v86_v55 = vpop.xlane.xlu1 %85 }
  0x95   :  { %v83_v56 = vpop.xlane.xlu0 %82  ;;  %v98_v1 = vmul.f32 %v96_v59, %v86_v55 }
  0x96   :  { %v97_v2 = vmul.f32 %v96_v59, %v83_v56 }
  0x98   :  { %v110_v60 = vpop.xlane.xlu1 %109 }
  0x99   :  { %v122_v61 = vmul.f32 %v120_v57, %v110_v60  ;;  %v107_v62 = vpop.xlane.xlu0 %106 }
  0x9a   :  { %v121_v0 = vmul.f32 %v120_v57, %v107_v62 }
  0x9b   :  { %v126_v4 = vadd.f32 %v122_v61, %v98_v1  ;;  %v940_v61 = vld [vmem:[%s1713_s7] ss:$0 sm:$0xff]  ;;  %s1214_s7 = smov 16  }
  0x9c   :  { %v138_v3 = vpop.xlane.xlu1 %137  ;;  %v125_v7 = vadd.f32 %v121_v0, %v97_v2 }
  0x9d   :  { %v150_v5 = vmul.f32 %v148_v63, %v138_v3  ;;  %v135_v6 = vpop.xlane.xlu0 %134 }
  0x9e   :  { %v149_v9 = vmul.f32 %v148_v63, %v135_v6 }
  0x9f   :  { %v154_v10 = vadd.f32 %v150_v5, %v126_v4 }
  0xa0   :  { %v153_v12 = vadd.f32 %v149_v9, %v125_v7  ;;  %v113_v13 = vpop.xlane.xlu1 %112 }
  0xa1   :  { %v165_v14 = vadd.f32 %v939_v8, %v154_v10  ;;  %v89_v15 = vpop.xlane.xlu0 %88  ;;  %v123_v19 = vmul.f32 %v120_v57, %v113_v13 }
  0xa2   :  { %v164_v17 = vadd.f32 %v939_v8, %v153_v12  ;;  %v99_v20 = vmul.f32 %v96_v59, %v89_v15 }
  0xa3   :  { %v173_v18 = vadd.f32 %v169_v11, %v165_v14 }
  0xa4   :  { %v116_v21 = vpop.xlane.xlu1 %115  ;;  %v172_v22 = vadd.f32 %v168_v16, %v164_v17  ;;  %v127_v30 = vadd.f32 %v123_v19, %v99_v20 }
  0xa5   :  { %v124_v23 = vmul.f32 %v120_v57, %v116_v21  ;;  %v92_v24 = vpop.xlane.xlu0 %91  ;;  %v547_v25 = vsel %vm184_vm2, %v173_v18, 0.0 }
  0xa6   :  { %v100_v27 = vmul.f32 %v96_v59, %v92_v24  ;;  %1002 = vmatprep.mubr.msk.f32.mxu1 %vm184_vm2, %v172_v22  ;;  %v546_v28 = vsel %vm184_vm2, %v172_v22, 0.0  ;;  %v564_v24 = vld [vmem:[%s1714_s8] sm:$0xff] }
  0xa7   :  { %v548_v29 = vadd.f32 %v547_v25, %v546_v28  ;;  %1003 = vmatmul.mubr.msk.f32.vlgmr.msra.gmra.mrb[0].mxu1 %vm184_vm2, %v173_v18  ;;  %v565_v25 = vld [vmem:[%s1714_s8 + $0x8] sm:$0xff] }
  0xa8   :  { %v128_v31 = vadd.f32 %v124_v23, %v100_v27  ;;  %v144_v32 = vpop.xlane.xlu1 %143  ;;  %1009 = vmatpush3.msra.mxu1 %v576_v26  ;;  %v566_v26 = vld [vmem:[%s1714_s8 + $0x10] sm:$0xff]  ;;  %v1224_v27 = vmov 0.0|0.0   ;;  %v1095_v28 = vpack.c.bf16 %v565_v25, %v564_v24 }
  0xa9   :  { %v152_v33 = vmul.f32 %v148_v63, %v144_v32  ;;  %v141_v34 = vpop.xlane.xlu0 %140  ;;  %v549_v36 = vrot.slane %v548_v29, 4  ;;  %1094 = vmatprep.subr.bf16.mxu0 %v1224_v27  ;;  %1112 = vmatprep.subr.bf16.mxu1 %v1224_v27  ;;  %v569_v32 = vld [vmem:[%s1714_s8 + $0x28] sm:$0xff] }
  0xaa   :  { %v151_v35 = vmul.f32 %v148_v63, %v141_v34  ;;  %1096 = vmatpush3.bf16.msra.mxu0 %v1095_v28  ;;  %v570_v34 = vld [vmem:[%s1714_s8 + $0x30] sm:$0xff] }
  0xab   :  { %v156_v37 = vadd.f32 %v152_v33, %v128_v31  ;;  %v550_v43 = vadd.f32 %v549_v36, %v548_v29  ;;  %v567_v29 = vld [vmem:[%s1714_s8 + $0x18] sm:$0xff]  ;;  %1097 = vmatprep.subr.bf16.mxu0 %v1224_v27  ;;  %v568_v31 = vld [vmem:[%s1714_s8 + $0x20] sm:$0xff] }
  0xac   :  { %v155_v39 = vadd.f32 %v151_v35, %v127_v30  ;;  %v1098_v30 = vpack.c.bf16 %v567_v29, %v566_v26  ;;  %v1101_v33 = vpack.c.bf16 %v569_v32, %v568_v31  ;;  %v571_v35 = vld [vmem:[%s1714_s8 + $0x38] sm:$0xff] }
  0xad   :  { %v167_v40 = vadd.f32 %v939_v8, %v156_v37  ;;  %v551_v48 = vrot.slane %v550_v43, 2  ;;  %v1104_v36 = vpack.c.bf16 %v571_v35, %v570_v34  ;;  %v572_v37 = vld [vmem:[%s1714_s8 + $0x40] sm:$0xff] }
  0xae   :  { %v166_v42 = vadd.f32 %v939_v8, %v155_v39  ;;  %1099 = vmatpush3.bf16.msra.mxu0 %v1098_v30 }
  0xaf   :  { %v175_v44 = vadd.f32 %v171_v38, %v167_v40  ;;  %v552_v52 = vadd.f32 %v551_v48, %v550_v43  ;;  %1100 = vmatprep.subr.bf16.mxu0 %v1224_v27  ;;  %v573_v38 = vld [vmem:[%s1714_s8 + $0x48] sm:$0xff]  ;;  %v574_v40 = vld [vmem:[%s1714_s8 + $0x50] sm:$0xff] }
  0xb0   :  { %v174_v45 = vadd.f32 %v170_v41, %v166_v42  ;;  %v1107_v39 = vpack.c.bf16 %v573_v38, %v572_v37  ;;  %v575_v41 = vld [vmem:[%s1714_s8 + $0x58] sm:$0xff] }
  0xb1   :  { %v556_v46 = vsel %vm184_vm2, %v175_v44, 0.0  ;;  %v553_v55 = vrot.slane %v552_v52, 1  ;;  %v1110_v42 = vpack.c.bf16 %v575_v41, %v574_v40 }
  0xb2   :  { %v555_v47 = vsel %vm184_vm2, %v174_v45, 0.0  ;;  %1005 = vmatprep.mubr.msk.f32.mxu1 %vm184_vm2, %v174_v45  ;;  %1102 = vmatpush3.bf16.msra.mxu0 %v1101_v33 }
  0xb3   :  { %v557_v50 = vadd.f32 %v556_v46, %v555_v47  ;;  %1006 = vmatmul.mubr.msk.f32.gmra.mrb[2].mxu1 %vm184_vm2, %v175_v44  ;;  %v554_v58 = vadd.f32 %v553_v55, %v552_v52  ;;  %1103 = vmatprep.subr.bf16.mxu0 %v1224_v27 }
  0xb4   :  { %1010 = vmatprep.mubr.msk.f32.mxu1 %vm1212_vm1, %v1211_v49 }
  0xb5   :  { %v558_v51 = vrot.slane %v557_v50, 4 }
  0xb6   :  { %1105 = vmatpush3.bf16.msra.mxu0 %v1104_v36 }
  0xb7   :  { %v559_v53 = vadd.f32 %v558_v51, %v557_v50  ;;  %1106 = vmatprep.subr.bf16.mxu0 %v1224_v27 }
  0xb9   :  { %v560_v54 = vrot.slane %v559_v53, 2 }
  0xba   :  { %1108 = vmatpush3.bf16.msra.mxu0 %v1107_v39 }
  0xbb   :  { %v561_v56 = vadd.f32 %v560_v54, %v559_v53  ;;  %1109 = vmatprep.subr.bf16.mxu0 %v1224_v27 }
  0xbd   :  { %v562_v57 = vrot.slane %v561_v56, 1 }
  0xbe   :  { %1111 = vmatpush3.bf16.msra.mxu0 %v1110_v42 }
  0xbf   :  { %v563_v59 = vadd.f32 %v562_v57, %v561_v56  ;;  %1130 = vmatprep.subr.bf16.mxu0 %v1224_v27 }
  0xc1   :  { %v580_v60 = vsel %vm579_vm3, %v563_v59, %v554_v58 }
  0xc2   :  { %1011 = vmatmul.mubr.msk.f32.vlgmr.msra.gmra.mrb[4].mxu1 %vm184_vm2, %v580_v60 }
  0xc3   :  { %1064 = vmatprep.mubr.msk.f32.mxu1 %vm1212_vm1, %v1211_v49 }
 0x17a   :  { %v1004_v62 = vpop.f32.mrb[0].mxu1 }
 0x17b   :  { %v269_v63 = vadd.f32 %v1004_v62, %v940_v61  ;;  %v263_v0 = vpop.f32.mrb[1].mxu1 }
 0x17c   :  { %v264_v1 = vadd.f32 %v940_v61, %v263_v0  ;;  %v738_v0 = vld [vmem:[%s1717_s11] sm:$0xff] }
 0x17d   :  { %v283_v2 = vmul.f32 %v269_v63, %v269_v63 }
 0x17e   :  { %v282_v3 = vmul.f32 %v264_v1, %v264_v1  ;;  %v739_v1 = vld [vmem:[%s1717_s11 + $0x8] sm:$0xff] }
 0x17f   :  { %v287_v4 = vadd.f32 1e-06, %v283_v2  ;;  %v740_v2 = vld [vmem:[%s1717_s11 + $0x10] sm:$0xff] }
 0x180   :  { %v286_v5 = vadd.f32 1e-06, %v282_v3 }
 0x181   :  { %1163 = vlog2.f32 %v287_v4  ;;  %v1113_v4 = vpack.c.bf16 %v739_v1, %v738_v0 }
 0x182   :  { %1165 = vlog2.f32 %v286_v5  ;;  %v741_v5 = vld [vmem:[%s1717_s11 + $0x18] sm:$0xff] }
 0x183   :  { %1114 = vmatpush3.bf16.msra.mxu1 %v1113_v4 }
 0x184   :  { %1115 = vmatprep.subr.bf16.mxu1 %v1224_v27 }
 0x186   :  { %v1007_v6 = vpop.f32.mrb[2].mxu1 }
 0x187   :  { %v273_v7 = vpop.f32.mrb[3].mxu1  ;;  %v279_v14 = vadd.f32 %v1007_v6, %v940_v61 }
 0x188   :  { %v274_v15 = vadd.f32 %v940_v61, %v273_v7  ;;  %v1116_v7 = vpack.c.bf16 %v741_v5, %v740_v2 }
 0x189   :  { %v285_v16 = vmul.f32 %v279_v14, %v279_v14  ;;  %v744_v14 = vld [vmem:[%s1717_s11 + $0x30] sm:$0xff] }
 0x18a   :  { %v284_v17 = vmul.f32 %v274_v15, %v274_v15  ;;  %1117 = vmatpush3.bf16.msra.mxu1 %v1116_v7  ;;  %v745_v15 = vld [vmem:[%s1717_s11 + $0x38] sm:$0xff] }
 0x18b   :  { %v1164_v8 = vpop.eup %1163  ;;  %v289_v18 = vadd.f32 1e-06, %v285_v16  ;;  %1118 = vmatprep.subr.bf16.mxu1 %v1224_v27 }
 0x18c   :  { %v1166_v9 = vpop.eup %1165  ;;  %v1398_v10 = vmul.f32 0.6931472, %v1164_v8  ;;  %v288_v19 = vadd.f32 1e-06, %v284_v17  ;;  %v742_v8 = vld [vmem:[%s1717_s11 + $0x20] sm:$0xff] }
 0x18d   :  { %v1400_v11 = vmul.f32 0.6931472, %v1166_v9  ;;  %1167 = vlog2.f32 %v289_v18  ;;  %v743_v9 = vld [vmem:[%s1717_s11 + $0x28] sm:$0xff]  ;;  %v1122_v18 = vpack.c.bf16 %v745_v15, %v744_v14 }
 0x18e   :  { %304 = vrot.lane.b32.xlu1 %v1398_v10, %s1213_s24  ;;  %1169 = vlog2.f32 %v288_v19 }
 0x18f   :  { %302 = vrot.lane.b32.xlu0 %v1400_v11, %s1213_s24 }
 0x192   :  { %316 = vrot.lane.b32.xlu1 %v1398_v10, %s1214_s7 }
 0x193   :  { %314 = vrot.lane.b32.xlu0 %v1400_v11, %s1214_s7 }
 0x195   :  { %v1410_v12 = vpop.f32.mrb[4].mxu1 }
 0x196   :  { %328 = vrot.lane.b32.xlu1 %v1398_v10, %s1215_s25  ;;  %v1012_v13 = vpop.f32.mrb[5].mxu1 }
 0x197   :  { %326 = vrot.lane.b32.xlu0 %v1400_v11, %s1215_s25  ;;  %v1168_v20 = vpop.eup %1167  ;;  %v1119_v13 = vpack.c.bf16 %v743_v9, %v742_v8 }
 0x198   :  { %v1170_v21 = vpop.eup %1169  ;;  %v1432_v22 = vmul.f32 0.6931472, %v1168_v20 }
 0x199   :  { %v1434_v23 = vmul.f32 0.6931472, %v1170_v21  ;;  %1120 = vmatpush3.bf16.msra.mxu1 %v1119_v13 }
 0x19a   :  { %340 = vrot.lane.b32.xlu1 %v1398_v10, %s1216_s26  ;;  %1121 = vmatprep.subr.bf16.mxu1 %v1224_v27 }
 0x19b   :  { %338 = vrot.lane.b32.xlu0 %v1400_v11, %s1216_s26 }
 0x19d   :  { %1123 = vmatpush3.bf16.msra.mxu1 %v1122_v18 }
 0x19e   :  { %352 = vrot.lane.b32.xlu1 %v1398_v10, %s1217_s0  ;;  %1124 = vmatprep.subr.bf16.mxu1 %v1224_v27 }
 0x19f   :  { %350 = vrot.lane.b32.xlu0 %v1400_v11, %s1217_s0 }
 0x1a2   :  { %364 = vrot.lane.b32.xlu1 %v1398_v10, %s1218_s27 }
 0x1a3   :  { %362 = vrot.lane.b32.xlu0 %v1400_v11, %s1218_s27 }
 0x1a6   :  { %376 = vrot.lane.b32.xlu1 %v1398_v10, %s1219_s28 }
 0x1a7   :  { %374 = vrot.lane.b32.xlu0 %v1400_v11, %s1219_s28 }
 0x1aa   :  { %388 = vrot.lane.b32.xlu1 %v1398_v10, %s1220_s29 }
 0x1ab   :  { %386 = vrot.lane.b32.xlu0 %v1400_v11, %s1220_s29 }
 0x1ae   :  { %400 = vrot.lane.b32.xlu1 %v1398_v10, %s1221_s6 }
 0x1af   :  { %398 = vrot.lane.b32.xlu0 %v1400_v11, %s1221_s6 }
 0x1b2   :  { %308 = vrot.lane.b32.xlu1 %v1432_v22, %s1213_s24 }
 0x1b3   :  { %306 = vrot.lane.b32.xlu0 %v1434_v23, %s1213_s24 }
 0x1b6   :  { %320 = vrot.lane.b32.xlu1 %v1432_v22, %s1214_s7 }
 0x1b7   :  { %410 = vrot.lane.b32.xlu0 %v1400_v11, %s1222_s30 }
 0x1ba   :  { %332 = vrot.lane.b32.xlu1 %v1432_v22, %s1215_s25 }
 0x1bb   :  { %330 = vrot.lane.b32.xlu0 %v1434_v23, %s1215_s25 }
 0x1be   :  { %344 = vrot.lane.b32.xlu1 %v1432_v22, %s1216_s26 }
 0x1bf   :  { %342 = vrot.lane.b32.xlu0 %v1434_v23, %s1216_s26 }
 0x1c2   :  { %356 = vrot.lane.b32.xlu1 %v1432_v22, %s1217_s0 }
 0x1c3   :  { %354 = vrot.lane.b32.xlu0 %v1434_v23, %s1217_s0 }
 0x1c6   :  { %368 = vrot.lane.b32.xlu1 %v1432_v22, %s1218_s27 }
 0x1c7   :  { %366 = vrot.lane.b32.xlu0 %v1434_v23, %s1218_s27 }
 0x1ca   :  { %380 = vrot.lane.b32.xlu1 %v1432_v22, %s1219_s28 }
 0x1cb   :  { %378 = vrot.lane.b32.xlu0 %v1434_v23, %s1219_s28 }
 0x1ce   :  { %392 = vrot.lane.b32.xlu1 %v1432_v22, %s1220_s29 }
 0x1cf   :  { %390 = vrot.lane.b32.xlu0 %v1434_v23, %s1220_s29 }
 0x1d2   :  { %404 = vrot.lane.b32.xlu1 %v1432_v22, %s1221_s6 }
 0x1d3   :  { %402 = vrot.lane.b32.xlu0 %v1434_v23, %s1221_s6 }
 0x1d6   :  { %416 = vrot.lane.b32.xlu1 %v1432_v22, %s1222_s30 }
 0x1d7   :  { %414 = vrot.lane.b32.xlu0 %v1434_v23, %s1222_s30 }
 0x1da   :  { %318 = vrot.lane.b32.xlu1 %v1434_v23, %s1214_s7 }
 0x1db   :  { %426 = vrot.lane.b32.xlu0 %v1434_v23, %s1223_s4 }
 0x1de   :  { %428 = vrot.lane.b32.xlu1 %v1432_v22, %s1223_s4 }
 0x1df   :  { %422 = vrot.lane.b32.xlu0 %v1400_v11, %s1223_s4 }
 0x1e2   :  { %412 = vrot.lane.b32.xlu1 %v1398_v10, %s1222_s30 }
 0x1e6   :  { %424 = vrot.lane.b32.xlu1 %v1398_v10, %s1223_s4 }
 0x200   :  { %v305_v43 = vpop.permute.xlu1 %304 }
 0x201   :  { %v303_v44 = vpop.permute.xlu0 %302  ;;  %v435_v45 = vsel %vm184_vm2, %v1398_v10, %v305_v43 }
 0x202   :  { %v434_v47 = vsel %vm184_vm2, %v1400_v11, %v303_v44 }
 0x204   :  { %v317_v46 = vpop.permute.xlu1 %316 }
 0x205   :  { %v440_v48 = vsel %vm438_vm4, %v435_v45, %v317_v46  ;;  %v315_v50 = vpop.permute.xlu0 %314 }
 0x206   :  { %v439_v51 = vsel %vm438_vm4, %v434_v47, %v315_v50 }
 0x208   :  { %v329_v52 = vpop.permute.xlu1 %328 }
 0x209   :  { %v445_v53 = vsel %vm443_vm5, %v440_v48, %v329_v52  ;;  %v327_v54 = vpop.permute.xlu0 %326 }
 0x20a   :  { %v1528_v55 = vsel %vm443_vm5, %v439_v51, %v327_v54 }
 0x20c   :  { %v341_v56 = vpop.permute.xlu1 %340 }
 0x20d   :  { %v450_v57 = vsel %vm448_vm6, %v445_v53, %v341_v56  ;;  %v339_v58 = vpop.permute.xlu0 %338 }
 0x20e   :  { %v449_v46 = vsel %vm448_vm6, %v1528_v55, %v339_v58 }
 0x210   :  { %v353_v59 = vpop.permute.xlu1 %352 }
 0x211   :  { %v1532_v60 = vsel %vm453_vm7, %v450_v57, %v353_v59  ;;  %v351_v61 = vpop.permute.xlu0 %350 }
 0x212   :  { %v454_v48 = vsel %vm453_vm7, %v449_v46, %v351_v61 }
 0x214   :  { %v1534_v62 = vpop.permute.xlu1 %364 }
 0x215   :  { %v363_v63 = vpop.permute.xlu0 %362  ;;  %v460_v15 = vsel %vm458_vm8, %v1532_v60, %v1534_v62 }
 0x216   :  { %v459_v52 = vsel %vm458_vm8, %v454_v48, %v363_v63  ;;  %v945_v63 = vld [vmem:[%s1708_s2] ss:$0 sm:$0xff] }
 0x218   :  { %v1545_v3 = vpop.permute.xlu1 %376 }
 0x219   :  { %v375_v6 = vpop.permute.xlu0 %374 }
 0x21a   :  { %v464_v56 = vsel %vm463_vm9, %v459_v52, %v375_v6 }
 0x21c   :  { %v1557_v10 = vpop.permute.xlu1 %388 }
 0x21d   :  { %v387_v11 = vpop.permute.xlu0 %386 }
 0x220   :  { %v1566_v16 = vpop.permute.xlu1 %400 }
 0x221   :  { %v399_v17 = vpop.permute.xlu0 %398 }
 0x224   :  { %v309_v19 = vpop.permute.xlu1 %308 }
 0x225   :  { %v307_v20 = vpop.permute.xlu0 %306  ;;  %v437_v40 = vsel %vm184_vm2, %v1432_v22, %v309_v19 }
 0x226   :  { %v436_v22 = vsel %vm184_vm2, %v1434_v23, %v307_v20  ;;  %v469_v23 = vsel %vm468_vm10, %v464_v56, %v387_v11  ;;  %v465_v20 = vsel %vm463_vm9, %v460_v15, %v1545_v3  ;;  %v832_v15 = vld [vmem:[%s1719_s13 + $0x8] sm:$0xff] }
 0x227   :  { %v474_v0 = vsel %vm473_vm11, %v469_v23, %v399_v17 }
 0x228   :  { %v321_v21 = vpop.permute.xlu1 %320 }
 0x229   :  { %v411_v24 = vpop.permute.xlu0 %410  ;;  %v442_v41 = vsel %vm438_vm4, %v437_v40, %v321_v21 }
 0x22a   :  { %v479_v5 = vsel %vm478_vm12, %v474_v0, %v411_v24 }
 0x22c   :  { %v333_v25 = vpop.permute.xlu1 %332 }
 0x22d   :  { %v331_v26 = vpop.permute.xlu0 %330  ;;  %v447_v43 = vsel %vm443_vm5, %v442_v41, %v333_v25  ;;  %v470_v25 = vsel %vm468_vm10, %v465_v20, %v1557_v10 }
 0x230   :  { %v345_v28 = vpop.permute.xlu1 %344 }
 0x231   :  { %v343_v29 = vpop.permute.xlu0 %342  ;;  %v452_v45 = vsel %vm448_vm6, %v447_v43, %v345_v28  ;;  %v475_v28 = vsel %vm473_vm11, %v470_v25, %v1566_v16 }
 0x234   :  { %v357_v30 = vpop.permute.xlu1 %356 }
 0x235   :  { %v355_v31 = vpop.permute.xlu0 %354  ;;  %v457_v47 = vsel %vm453_vm7, %v452_v45, %v357_v30 }
 0x238   :  { %v369_v32 = vpop.permute.xlu1 %368 }
 0x239   :  { %v367_v33 = vpop.permute.xlu0 %366  ;;  %v462_v50 = vsel %vm458_vm8, %v457_v47, %v369_v32 }
 0x23c   :  { %v381_v34 = vpop.permute.xlu1 %380 }
 0x23d   :  { %v379_v35 = vpop.permute.xlu0 %378  ;;  %v467_v53 = vsel %vm463_vm9, %v462_v50, %v381_v34 }
 0x240   :  { %v393_v36 = vpop.permute.xlu1 %392 }
 0x241   :  { %v391_v37 = vpop.permute.xlu0 %390  ;;  %v472_v57 = vsel %vm468_vm10, %v467_v53, %v393_v36 }
 0x244   :  { %v405_v38 = vpop.permute.xlu1 %404 }
 0x245   :  { %v403_v39 = vpop.permute.xlu0 %402  ;;  %v477_v59 = vsel %vm473_vm11, %v472_v57, %v405_v38  ;;  %v946_v57 = vld [vmem:[%s1709_s3] ss:$0 sm:$0xff] }
 0x248   :  { %v417_v42 = vpop.permute.xlu1 %416 }
 0x249   :  { %v415_v44 = vpop.permute.xlu0 %414  ;;  %v482_v1 = vsel %vm478_vm12, %v477_v59, %v417_v42 }
 0x24c   :  { %v319_v51 = vpop.permute.xlu1 %318 }
 0x24d   :  { %v441_v54 = vsel %vm438_vm4, %v436_v22, %v319_v51  ;;  %v427_v55 = vpop.permute.xlu0 %426 }
 0x24e   :  { %v446_v58 = vsel %vm443_vm5, %v441_v54, %v331_v26 }
 0x24f   :  { %v451_v61 = vsel %vm448_vm6, %v446_v58, %v343_v29 }
 0x250   :  { %v456_v2 = vsel %vm453_vm7, %v451_v61, %v355_v31  ;;  %v429_v4 = vpop.permute.xlu1 %428 }
 0x251   :  { %v461_v6 = vsel %vm458_vm8, %v456_v2, %v367_v33  ;;  %v487_v7 = vsel %vm483_vm13, %v482_v1, %v429_v4  ;;  %v423_v8 = vpop.permute.xlu0 %422 }
 0x252   :  { %v466_v9 = vsel %vm463_vm9, %v461_v6, %v379_v35  ;;  %v498_v11 = vmul.f32 %v945_v63, %v487_v7  ;;  %v484_v13 = vsel %vm483_vm13, %v479_v5, %v423_v8  ;;  %v746_v7 = vld [vmem:[%s1717_s11 + $0x40] sm:$0xff]  ;;  %v747_v8 = vld [vmem:[%s1717_s11 + $0x48] sm:$0xff] }
 0x253   :  { %v471_v14 = vsel %vm468_vm10, %v466_v9, %v391_v37  ;;  %v495_v18 = vmul.f32 %v945_v63, %v484_v13  ;;  %v1125_v9 = vpack.c.bf16 %v747_v8, %v746_v7 }
 0x254   :  { %v476_v17 = vsel %vm473_vm11, %v471_v14, %v403_v39  ;;  %v413_v19 = vpop.permute.xlu1 %412  ;;  %v505_v24 = vmul.f32 1.442695, %v498_v11  ;;  %v748_v11 = vld [vmem:[%s1717_s11 + $0x50] sm:$0xff]  ;;  %v831_v14 = vld [vmem:[%s1719_s13] sm:$0xff] }
 0x255   :  { %v481_v21 = vsel %vm478_vm12, %v476_v17, %v415_v44  ;;  %v499_v60 = vmul.f32 1.442695, %v495_v18  ;;  %v480_v62 = vsel %vm478_vm12, %v475_v28, %v413_v19  ;;  %1126 = vmatpush3.bf16.msra.mxu1 %v1125_v9  ;;  %v833_v17 = vld [vmem:[%s1719_s13 + $0x10] sm:$0xff]  ;;  %v1131_v18 = vpack.c.bf16 %v832_v15, %v831_v14  ;;  %v834_v19 = vld [vmem:[%s1719_s13 + $0x18] sm:$0xff] }
 0x256   :  { %v486_v26 = vsel %vm483_vm13, %v481_v21, %v427_v55  ;;  %1171 = vpow2.f32 %v505_v24  ;;  %1127 = vmatprep.subr.bf16.mxu1 %v1224_v27  ;;  %v1134_v20 = vpack.c.bf16 %v834_v19, %v833_v17  ;;  %v835_v21 = vld [vmem:[%s1719_s13 + $0x20] sm:$0xff]  ;;  %v836_v24 = vld [vmem:[%s1719_s13 + $0x28] sm:$0xff]  ;;  %v838_v28 = vld [vmem:[%s1719_s13 + $0x38] sm:$0xff] }
 0x257   :  { %v497_v29 = vmul.f32 %v945_v63, %v486_v26  ;;  %v1137_v25 = vpack.c.bf16 %v836_v24, %v835_v21  ;;  %v837_v26 = vld [vmem:[%s1719_s13 + $0x30] sm:$0xff] }
 0x258   :  { %v425_v30 = vpop.permute.xlu1 %424 }
 0x259   :  { %v503_v31 = vmul.f32 1.442695, %v497_v29  ;;  %v485_v3 = vsel %vm483_vm13, %v480_v62, %v425_v30  ;;  %v1140_v29 = vpack.c.bf16 %v838_v28, %v837_v26  ;;  %v840_v62 = vld [vmem:[%s1719_s13 + $0x48] sm:$0xff] }
 0x25a   :  { %v496_v32 = vmul.f32 %v945_v63, %v485_v3  ;;  %v949_v3 = vld [vmem:[%s1716_s10] ss:$0 sm:$0xff] }
 0x25b   :  { %1173 = vpow2.f32 %v503_v31 }
 0x25c   :  { %1175 = vpow2.f32 %v499_v60  ;;  %v501_v33 = vmul.f32 1.442695, %v496_v32  ;;  %v839_v60 = vld [vmem:[%s1719_s13 + $0x40] sm:$0xff] }
 0x25d   :  { %v1143_v30 = vpack.c.bf16 %v840_v62, %v839_v60 }
 0x25e   :  { %1177 = vpow2.f32 %v501_v33 }
 0x260   :  { %v1172_v10 = vpop.eup %1171 }
 0x261   :  { %v518_v36 = vsel %vm507_vm14, %v1172_v10, 0.0 }
 0x265   :  { %v1174_v34 = vpop.eup %1173 }
 0x266   :  { %v1176_v35 = vpop.eup %1175  ;;  %v517_v16 = vsel %vm507_vm14, %v1174_v34, 0.0 }
 0x267   :  { %v519_v37 = vadd.f32 %v518_v36, %v517_v16  ;;  %v508_v39 = vsel %vm507_vm14, %v1176_v35, 0.0  ;;  %v841_v35 = vld [vmem:[%s1719_s13 + $0x50] sm:$0xff]  ;;  %v950_v36 = vld [vmem:[%s1718_s12] ss:$0 sm:$0xff] }
 0x268   :  { %v1178_v38 = vpop.eup %1177 }
 0x269   :  { %v509_v40 = vsel %vm507_vm14, %v1178_v38, 0.0  ;;  %v520_v41 = vrot.slane %v519_v37, 4 }
 0x26a   :  { %v510_v42 = vadd.f32 %v509_v40, %v508_v39  ;;  %v952_v40 = vld [vmem:[%s1720_s14] ss:$0 sm:$0xff] }
 0x26b   :  { %v521_v43 = vadd.f32 %v520_v41, %v519_v37 }
 0x26c   :  { %v511_v44 = vrot.slane %v510_v42, 4 }
 0x26d   :  { %v522_v45 = vrot.slane %v521_v43, 2 }
 0x26e   :  { %v512_v46 = vadd.f32 %v511_v44, %v510_v42 }
 0x26f   :  { %v523_v47 = vadd.f32 %v522_v45, %v521_v43 }
 0x270   :  { %v513_v48 = vrot.slane %v512_v46, 2 }
 0x271   :  { %v524_v22 = vrot.slane %v523_v47, 1 }
 0x272   :  { %v514_v50 = vadd.f32 %v513_v48, %v512_v46 }
 0x273   :  { %v525_v51 = vadd.f32 %v524_v22, %v523_v47 }
 0x274   :  { %v515_v52 = vrot.slane %v514_v50, 1 }
 0x275   :  { %v528_v53 = vmul.f32 0.0625, %v525_v51 }
 0x276   :  { %v516_v54 = vadd.f32 %v515_v52, %v514_v50 }
 0x277   :  { %1179 = vlog2.f32 %v528_v53 }
 0x278   :  { %v527_v55 = vmul.f32 0.0625, %v516_v54 }
 0x27a   :  { %1181 = vlog2.f32 %v527_v55 }
 0x281   :  { %v1180_v56 = vpop.eup %1179 }
 0x282   :  { %v532_v58 = vmul.f32 0.6931472, %v1180_v56 }
 0x284   :  { %v1182_v23 = vpop.eup %1181  ;;  %v541_v59 = vmul.f32 %v946_v57, %v532_v58 }
 0x285   :  { %v530_v61 = vmul.f32 0.6931472, %v1182_v23 }
 0x286   :  { %v544_v63 = vmul.f32 1.442695, %v541_v59 }
 0x287   :  { %v540_v0 = vmul.f32 %v946_v57, %v530_v61 }
 0x288   :  { %1183 = vpow2.f32 %v544_v63 }
 0x289   :  { %v542_v1 = vmul.f32 1.442695, %v540_v0 }
 0x28b   :  { %1185 = vpow2.f32 %v542_v1 }
 0x292   :  { %v1184_v2 = vpop.eup %1183 }
 0x293   :  { %v655_v4 = vrot.slane %v1184_v2, 7 }
 0x295   :  { %v1186_v5 = vpop.eup %1185 }
 0x296   :  { %v656_v6 = vsel %vm579_vm3, %v655_v4, %v1186_v5 }
 0x297   :  { %1038 = vmatmul.mubr.msk.f32.vlgmr.msra.gmra.mrb[0].mxu0 %vm507_vm14, %v656_v6 }
 0x298   :  { %1091 = vmatprep.mubr.msk.f32.mxu0 %vm1212_vm1, %v1211_v49  ;;  %v749_v49 = vld [vmem:[%s1717_s11 + $0x58] sm:$0xff]  ;;  %1132 = vmatpush3.bf16.msra.mxu0 %v1131_v18 }
 0x299   :  { %v1128_v13 = vpack.c.bf16 %v749_v49, %v748_v11  ;;  %1133 = vmatprep.subr.bf16.mxu0 %v1224_v27 }
 0x29b   :  { %1129 = vmatpush3.bf16.msra.mxu1 %v1128_v13 }
 0x29c   :  { %1135 = vmatpush3.bf16.msra.mxu0 %v1134_v20 }
 0x29d   :  { %1136 = vmatprep.subr.bf16.mxu0 %v1224_v27 }
 0x2a0   :  { %1138 = vmatpush3.bf16.msra.mxu0 %v1137_v25 }
 0x2a1   :  { %1139 = vmatprep.subr.bf16.mxu0 %v1224_v27 }
 0x2a4   :  { %1141 = vmatpush3.bf16.msra.mxu0 %v1140_v29 }
 0x2a5   :  { %1142 = vmatprep.subr.bf16.mxu0 %v1224_v27 }
 0x2a8   :  { %1144 = vmatpush3.bf16.msra.mxu0 %v1143_v30 }
 0x2a9   :  { %1145 = vmatprep.subr.bf16.mxu0 %v1224_v27  ;;  %v842_v27 = vld [vmem:[%s1719_s13 + $0x58] sm:$0xff]  ;;  %s1187_s13 = scalar_lea.vmem %s932_s22, 32 }
 0x2aa   :  { %v1146_v16 = vpack.c.bf16 %v842_v27, %v841_v35  ;;  %p1188_p0 = scmp.ne.s32.totalorder %s932_s22, %s1187_s13  ;;  %p1193_p2 = scmp.lt.s32.totalorder %s1187_s13, %s1187_s13 }
 0x2ac   :  { %1147 = vmatpush3.bf16.msra.mxu0 %v1146_v16  ;;  %p1194_p3 = por %p1193_p2, %p1192_p1 }
 0x2ae   :  { %p1195_p4 = pnand %p1194_p3, %p1188_p0 }
 0x36a   :  { %v725_v31 = vpop.f32.mrb[0].mxu0 }
 0x36b   :  { %v726_v32 = vadd.f32 %v725_v31, %v1410_v12  ;;  %v1039_v33 = vpop.f32.mrb[1].mxu0 }
 0x36d   :  { %v736_v10 = vadd.f32 %v949_v3, %v726_v32 }
 0x36f   :  { %v737_v34 = vmax.f32 %v736_v10, 0.0 }
 0x371   :  { %1065 = vmatmul.mubr.msk.f32.vlgmr.msra.gmra.mrb[6].mxu1 %vm507_vm14, %v737_v34 }
 0x444   :  { %v826_v12 = vpop.f32.mrb[6].mxu1 }
 0x445   :  { %v827_v37 = vadd.f32 %v950_v36, %v826_v12  ;;  %v1066_v38 = vpop.f32.mrb[7].mxu1 }
 0x447   :  { %v830_v39 = vmax.f32 %v827_v37, 0.0 }
 0x449   :  { %1092 = vmatmul.mubr.msk.f32.vlgmr.msra.gmra.mrb[2].mxu0 %vm507_vm14, %v830_v39 }
 0x51c   :  { %v919_v41 = vpop.f32.mrb[2].mxu0 }
 0x51d   :  { %v920_v42 = vadd.f32 %v952_v40, %v919_v41  ;;  %v1093_v43 = vpop.f32.mrb[3].mxu0 }
 0x51f   :  { %924 = vst.msk [vmem:[#allocation2] sm:$0x3] %vm923_vm15, %v920_v42 }
 0x520   :  { %1198 = shalt.err (!%p1195_p4)
}
 0x521   :  { %s1199_s23 = scalar_lea.hbm %s1721_s15, 32 }
 0x522   :  { %p1200_p5 = scmp.ne.s32.totalorder %s1721_s15, %s1199_s23  ;;  %p1203_p6 = scmp.lt.u32.totalorder %s1199_s23, %s1721_s15 }
 0x524   :  { %p1205_p7 = pnand %p1203_p6, %p1200_p5 }
 0x526   :  { %1208 = shalt.err (!%p1205_p7)
}
 0x527   :  { %934 = dma.vmem_to_hbm [thread:$0]  %s932_s22, 32, %s1721_s15, [#allocation3]  }
 0x528   :  { %1209 = dma.done.wait [#allocation3], 32  }
 0x529   :  { %1210 = vsyncadd [#allocation3], 4294967264 }
 0x52a   :  { %938 = vsyncpa [#allocation3], 1 }

</bundles_post_ra>
